<compile_context>
chip_gen: v6e
topology: v6e:2x2x1
jax: 0.10.0
libtpu: 0.0.40
codegen_flags: <defaults>
</compile_context>

<pallas_src>
import math

import jax
import jax.numpy as jnp
from jax.experimental import pallas as pl
from jax.experimental.pallas import tpu as pltpu

_LANE = 128


def _round_up(v, m):
    return (v + m - 1) // m * m


def _sublane_multiple(dtype):
    # f32 -> 8, bf16 -> 16, int8/fp8 -> 32 rows per packed sublane group.
    return max(8, 32 // jnp.dtype(dtype).itemsize)


def _fourier_feature_kernel(x_ref, w_ref, o_ref):
    # x_ref: (TB, C)       w_ref: (C, M_pad) -- 2*pi already folded in on the host
    # o_ref: (TB, 2*M_pad) -- [sin | cos] halves along the lane axis
    # K = C_in is tiny so the MXU is nearly idle; this kernel is bound by the HBM output
    # write (v5e/v6e) or the sin+cos EUP chain (v7x). Spend the free MXU slack on full
    # f32 precision instead of loosening the accuracy tolerance.
    proj = jnp.dot(
        x_ref[...],
        w_ref[...],
        preferred_element_type=jnp.float32,
        precision=jax.lax.Precision.HIGHEST,
    )
    m = proj.shape[-1]  # static, lane-aligned (multiple of 128)
    # Both half stores are full-lane unmasked stores (m % 128 == 0 by construction).
    o_ref[:, :m] = jnp.sin(proj).astype(o_ref.dtype)
    o_ref[:, m:] = jnp.cos(proj).astype(o_ref.dtype)


def fourier_feature(x, weight, *, block_b=None, out_dtype=None):
    """Pallas TPU fourier feature. x: (B, C_in), weight: (M, C_in) -> (B, 2*M)."""
    B, C = x.shape
    M, C_w = weight.shape
    assert C == C_w, "weight channel dim must match input channels"
    out_dtype = jnp.dtype(x.dtype) if out_dtype is None else jnp.dtype(out_dtype)

    # One-time host/XLA-side fold of the 2*pi scale + transpose to (C, M), lane-padded.
    w2 = ((2.0 * math.pi) * weight).T.astype(weight.dtype)  # (C, M)
    M_pad = _round_up(M, _LANE)
    if M_pad != M:
        w2 = jnp.pad(w2, ((0, 0), (0, M_pad - M)))  # sin(0)=0 / cos(0)=1 in padded lanes

    x_bytes = jnp.dtype(x.dtype).itemsize
    o_bytes = out_dtype.itemsize
    w_bytes = jnp.dtype(w2.dtype).itemsize

    row_mult = max(_sublane_multiple(x.dtype), _sublane_multiple(out_dtype))

    if block_b is None:
        # Padding-aware per-row VMEM footprint of the pipelined (double-buffered) tiles:
        # the x tile's last dim pads to 128 lanes; the output's last dim is already a
        # lane multiple (2 * M_pad).
        x_row = _round_up(C, _LANE) * x_bytes
        o_row = (2 * M_pad) * o_bytes
        bytes_per_row = 2 * (x_row + o_row)  # x2: double buffering
        # Resident weight (constant index_map -> not re-DMA'd per step); count both
        # pipeline copies anyway to keep the accounting conservative.
        w_fixed = 2 * _round_up(C, _sublane_multiple(w2.dtype)) * M_pad * w_bytes
        vmem_budget = 24 * 1024 * 1024
        cand = (vmem_budget - w_fixed) // bytes_per_row // row_mult * row_mult
        cand = max(row_mult, cand)
        # Keep >= 2 grid steps when the batch allows it so the "parallel" batch axis can
        # shard across both v7x TensorCores (and both EUPs). No-op for tiny batches.
        if B >= 2 * row_mult:
            cand = min(cand, _round_up(pl.cdiv(B, 2), row_mult))
        # Full-batch block when it fits (block_b == full dim is always a legal BlockSpec);
        # otherwise a sublane-aligned tile.
        block_b = int(B) if B <= cand else int(cand)

    grid = (pl.cdiv(B, block_b),)

    cost = pl.CostEstimate(
        flops=2 * B * M_pad * C,
        transcendentals=2 * B * M_pad,  # one sin + one cos per projected element
        bytes_accessed=x_bytes * B * C + o_bytes * B * 2 * M_pad + w_bytes * C * M_pad,
    )

    out = pl.pallas_call(
        _fourier_feature_kernel,
        out_shape=jax.ShapeDtypeStruct((B, 2 * M_pad), out_dtype),
        grid_spec=pltpu.PrefetchScalarGridSpec(
            num_scalar_prefetch=0,
            grid=grid,
            in_specs=[
                pl.BlockSpec((block_b, C), lambda i: (i, 0)),     # batch-tiled x
                pl.BlockSpec((C, M_pad), lambda i: (0, 0)),       # full weight, resident
            ],
            out_specs=pl.BlockSpec((block_b, 2 * M_pad), lambda i: (i, 0)),
        ),
        compiler_params=pltpu.CompilerParams(
            dimension_semantics=("parallel",),
            vmem_limit_bytes=48 * 1024 * 1024,
        ),
        cost_estimate=cost,
    )(x, w2)

    if M_pad != M:
        # Drop the lane padding; realistic mapping sizes (M % 128 == 0) skip this entirely.
        out = jnp.concatenate([out[:, :M], out[:, M_pad:M_pad + M]], axis=-1)
    return out


class ObservedFourierFeature:
    """JAX analogue of kompil's ObservedFourierFeature (forward only)."""

    def __init__(self, input_chan, output_chan, weight=None):
        self.input_chan = input_chan
        self.output_chan = output_chan
        self.weight = weight  # (mapping_size, input_chan), as in the float FourierFeature
        if weight is not None:
            assert output_chan == 2 * weight.shape[0]
            assert input_chan == weight.shape[1]
        # TODO(synk): torch quantization observer / qconfig plumbing (from_float) carries no
        # runtime compute, so it has no Pallas equivalent; only forward() is implemented.

    def __call__(self, x):
        return fourier_feature(x, self.weight)


if __name__ == "__main__":
    # Small shapes implied by the module: input_chan=4, mapping_size=16 -> output_chan=32, batch=8.
    B, input_chan, mapping_size = 8, 4, 16
    output_chan = 2 * mapping_size

    key = jax.random.PRNGKey(0)
    kx, kw = jax.random.split(key)
    x = jax.random.uniform(kx, (B, input_chan), dtype=jnp.float32)
    # Deterministic synthetic weight, matching FourierFeature.__init__: randn(M, C) * scale.
    scale = 1.0
    weight = jax.random.normal(kw, (mapping_size, input_chan), dtype=jnp.float32) * scale

    mod = ObservedFourierFeature(input_chan, output_chan, weight)
    out = jax.block_until_ready(mod(x))

    # Pure-JAX reference of the exact torch semantics (full-precision dot on both sides,
    # so only the 2*pi-fold ordering and sin/cos implementation differ).
    proj_ref = jnp.dot(2.0 * math.pi * x, weight.T, precision=jax.lax.Precision.HIGHEST)
    ref = jnp.concatenate([jnp.sin(proj_ref), jnp.cos(proj_ref)], axis=-1)

    assert out.shape == (B, output_chan)
    assert out.dtype == ref.dtype
    # HIGHEST-precision dot in the kernel lets this tighten from the previous 5e-4; the
    # remaining slack covers ULP-level argument deltas (fold ordering) and sin/cos
    # implementation differences between the TPU kernel and XLA.
    assert jnp.allclose(out, ref, atol=1e-4, rtol=1e-4), "mismatch vs reference"

    print("KERNEL_OK")
</pallas_src>

<mosaic_0001>
module attributes {stable_mosaic.version = 11 : i64} {
  func.func @_fourier_feature_kernel(%arg0: i32, %arg1: memref<8x4xf32, #tpu.memory_space<vmem>>, %arg2: memref<4x128xf32, #tpu.memory_space<vmem>>, %arg3: memref<8x256xf32, #tpu.memory_space<vmem>>) attributes {dimension_semantics = [#tpu.dimension_semantics<parallel>], iteration_bounds = array<i64: 1>, scalar_prefetch = 0 : i64, scratch_operands = 0 : i64, tpu.core_type = #tpu.core_type<tc>, window_params = [{transform_indices = @transform_0, window_bounds = array<i64: 8, 4>}, {pipeline_mode = #tpu.pipeline_mode<synchronous>, transform_indices = @transform_1, window_bounds = array<i64: 4, 128>}, {transform_indices = @transform_2, window_bounds = array<i64: 8, 256>}]} {
    %c0 = arith.constant 0 : index
    %c0_0 = arith.constant 0 : index
    %0 = vector.load %arg1[%c0, %c0_0] : memref<8x4xf32, #tpu.memory_space<vmem>>, vector<8x4xf32>
    %c0_1 = arith.constant 0 : index
    %c0_2 = arith.constant 0 : index
    %1 = vector.load %arg2[%c0_1, %c0_2] : memref<4x128xf32, #tpu.memory_space<vmem>>, vector<4x128xf32>
    %cst = arith.constant dense<0.000000e+00> : vector<8x128xf32>
    %2 = tpu.matmul %0, %1, %cst {dimension_numbers = #tpu.dot_dimension_numbers<[1], [0], [0], [1], [0, 0, 1, 1], [], []>, precision = #tpu.contract_precision<fp32>} : vector<8x4xf32>, vector<4x128xf32>, vector<8x128xf32> -> vector<8x128xf32>
    %3 = math.sin %2 : vector<8x128xf32>
    %c0_3 = arith.constant 0 : index
    %c0_4 = arith.constant 0 : index
    %4 = vector.load %arg3[%c0_3, %c0_4] : memref<8x256xf32, #tpu.memory_space<vmem>>, vector<8x128xf32>
    tpu.vector_store %arg3[%c0_3, %c0_4], %3 {strides = array<i32>} : memref<8x256xf32, #tpu.memory_space<vmem>>, vector<8x128xf32>,
    %5 = math.cos %2 : vector<8x128xf32>
    %c0_5 = arith.constant 0 : index
    %c128 = arith.constant 128 : index
    %6 = vector.load %arg3[%c0_5, %c128] : memref<8x256xf32, #tpu.memory_space<vmem>>, vector<8x128xf32>
    tpu.vector_store %arg3[%c0_5, %c128], %5 {strides = array<i32>} : memref<8x256xf32, #tpu.memory_space<vmem>>, vector<8x128xf32>,
    return
  }
  func.func @transform_0(%arg0: i32) -> (i32, i32) {
    %c0_i32 = arith.constant 0 : i32
    %c0_i32_0 = arith.constant 0 : i32
    return %arg0, %c0_i32 : i32, i32
  }
  func.func @transform_1(%arg0: i32) -> (i32, i32) {
    %c0_i32 = arith.constant 0 : i32
    %c0_i32_0 = arith.constant 0 : i32
    %c0_i32_1 = arith.constant 0 : i32
    return %c0_i32, %c0_i32_0 : i32, i32
  }
  func.func @transform_2(%arg0: i32) -> (i32, i32) {
    %c0_i32 = arith.constant 0 : i32
    %c0_i32_0 = arith.constant 0 : i32
    return %arg0, %c0_i32 : i32, i32
  }
}

</mosaic_0001>

<bundles_post_ra>
// kernel: tpu_custom_call.1
= control target key start
LH: loop header
LB: loop body
LE: loop exit
PB: predicated region body
PF: predicated region fallthrough
CT: control target
= control target key end

     0   :  { %vm18_vm0 = vcmask 1043456   ;;  %v780_v2 = vmov 0.0   ;;  %vm781_vm1 = vmmov 0   ;;  %vm14_vm2 = vcmask 31744   ;;  %s840_s0 = inlined_call_operand.vmem [shape: f32[8,4], index: 0, kind: input, shape index: {}]   ;;  %s841_s1 = inlined_call_operand.vmem [shape: f32[4,128], index: 1, kind: input, shape index: {}]   ;;  %s842_s2 = inlined_call_operand.hbm [shape: f32[8,256], index: 2, kind: output, shape index: {}]  }
   0x1   :  { %v13_v0 = vld [vmem:[%s841_s1] sm:$0xf]  ;;  %711 = vmatprep.subr.mxu0 %v780_v2  ;;  %713 = vmatprep.mubr.msk.f32.mxu0 %vm781_vm1, %v780_v2 }
   0x2   :  { %v12_v1 = vld [vmem:[%s840_s0] sm:$0xff]  ;;  %v20_v3 = vsel %vm18_vm0, %v13_v0, 0 }
   0x3   :  { %7 = vsyncpa [#allocation3], 0  ;;  %v53_v4 = vand.u32 4294901760, %v20_v3  ;;  %716 = vmatprep.subr.mxu1 %v780_v2  ;;  %v16_v5 = vsel %vm14_vm2, %v12_v1, 0  ;;  %718 = vmatprep.mubr.msk.f32.mxu1 %vm781_vm1, %v780_v2  ;;  %v782_v42 = vmov 683565275  }
   0x4   :  { %v88_v6 = vand.u32 4294901760, %v16_v5  ;;  %v783_v44 = vmov 2475754826   ;;  %v784_v47 = vmov 2131351028   ;;  %s788_s0 = smov [#allocation2]  }
   0x5   :  { %712 = vmatpush3.msra.mxu0 %v53_v4  ;;  %v130_v7 = vsub.f32 %v20_v3, %v53_v4  ;;  %v785_v50 = vmov 2102212464   ;;  %v786_v53 = vmov 920167782   ;;  %v787_v56 = vmov 1326507024  }
   0x6   :  { %721 = vmatprep.subr.mxu0 %v780_v2  ;;  %v89_v8 = vsub.f32 %v16_v5, %v88_v6  ;;  %s683_s1 = sshll.u32 %s788_s0, 4  ;;  %s684_s1 = int_to_ptr.vmem [resolvable:$true] %s683_s1 }
   0x7   :  { %v131_v9 = vand.u32 4294901760, %v130_v7  ;;  %s758_s13 = scalar_lea.vmem %s684_s1, 256  ;;  %p763_p1 = scmp.lt.s32.totalorder %s684_s1, %s684_s1 }
   0x8   :  { %v90_v10 = vand.u32 4294901760, %v89_v8  ;;  %p759_p0 = scmp.ne.s32.totalorder %s684_s1, %s758_s13  ;;  %p764_p2 = scmp.lt.s32.totalorder %s758_s13, %s758_s13 }
   0x9   :  { %v132_v11 = vsub.f32 %v130_v7, %v131_v9 }
   0xa   :  { %v91_v12 = vsub.f32 %v89_v8, %v90_v10  ;;  %p765_p3 = por %p764_p2, %p763_p1 }
   0xb   :  { %v133_v13 = vand.u32 4294901760, %v132_v11 }
   0xc   :  { %v92_v14 = vand.u32 4294901760, %v91_v12  ;;  %p766_p4 = pnand %p765_p3, %p759_p0 }
   0xd   :  { %717 = vmatpush3.msra.mxu1 %v133_v13 }
   0xe   :  { %714 = vmatmul.mubr.f32.vlgmr.msra.gmra.mxu0 %v92_v14  ;;  %719 = vmatmul.mubr.f32.vlgmr.msra.gmra.mxu1 %v88_v6 }
   0xf   :  { %722 = vmatpush3.msra.mxu0 %v130_v7  ;;  %726 = vmatprep.subr.mxu1 %v780_v2 }
  0x10   :  { %727 = vmatpush3.msra.mxu1 %v53_v4  ;;  %723 = vmatprep.mubr.msk.f32.mxu0 %vm781_vm1, %v780_v2 }
  0x11   :  { %731 = vmatprep.subr.mxu0 %v780_v2  ;;  %728 = vmatprep.mubr.msk.f32.mxu1 %vm781_vm1, %v780_v2 }
  0x12   :  { %724 = vmatmul.mubr.f32.vlgmr.msra.gmra.mxu0 %v89_v8  ;;  %729 = vmatmul.mubr.f32.vlgmr.msra.gmra.mxu1 %v90_v10 }
  0x13   :  { %732 = vmatpush3.msra.mxu0 %v131_v9  ;;  %736 = vmatprep.subr.mxu1 %v780_v2 }
  0x14   :  { %737 = vmatpush3.msra.mxu1 %v53_v4  ;;  %733 = vmatprep.mubr.msk.f32.mxu0 %vm781_vm1, %v780_v2 }
  0x15   :  { %738 = vmatprep.mubr.msk.f32.mxu1 %vm781_vm1, %v780_v2 }
  0x16   :  { %734 = vmatmul.mubr.f32.vlgmr.msra.gmra.mxu0 %v88_v6  ;;  %739 = vmatmul.mubr.f32.vlgmr.msra.gmra.mxu1 %v88_v6 }
  0xce   :  { %v94_v15 = vpop.f32.mrf.mxu0  ;;  %v170_v16 = vpop.f32.mrf.mxu1 }
  0xcf   :  { %v171_v17 = vadd.f32 %v170_v16, %v94_v15 }
  0xd0   :  { %v715_v18 = vpop.f32.mrf.mxu0  ;;  %v720_v19 = vpop.f32.mrf.mxu1 }
  0xd2   :  { %v244_v20 = vpop.f32.mrf.mxu0  ;;  %v318_v21 = vpop.f32.mrf.mxu1 }
  0xd3   :  { %v245_v22 = vadd.f32 %v244_v20, %v171_v17 }
  0xd4   :  { %v725_v23 = vpop.f32.mrf.mxu0  ;;  %v730_v24 = vpop.f32.mrf.mxu1 }
  0xd5   :  { %v319_v25 = vadd.f32 %v318_v21, %v245_v22 }
  0xd6   :  { %v392_v26 = vpop.f32.mrf.mxu0  ;;  %v464_v27 = vpop.f32.mrf.mxu1 }
  0xd7   :  { %v393_v28 = vadd.f32 %v392_v26, %v319_v25 }
  0xd8   :  { %v735_v29 = vpop.f32.mrf.mxu0  ;;  %v740_v30 = vpop.f32.mrf.mxu1 }
  0xd9   :  { %v816_v31 = vadd.f32 %v464_v27, %v393_v28 }
  0xdb   :  { %v471_v32 = vand.u32 2139095040, %v816_v31  ;;  %v468_v36 = vand.u32 2147483647, %v816_v31  ;;  %vm470_vm10 = vcmp.lt.s32.totalorder %v816_v31, 0  ;;  %vm560_vm2 = vweird.f32 %v816_v31 }
  0xdd   :  { %v472_v33 = vshrl.u32 %v471_v32, 23  ;;  %v475_v39 = vand.u32 8388607, %v468_v36  ;;  %vm469_vm11 = vcmp.le.f32.partialorder %v468_v36, 0.7853982 }
  0xdf   :  { %v691_v34 = vadd.s32 4294967169, %v472_v33  ;;  %v476_v58 = vor.u32 8388608, %v475_v39 }
  0xe1   :  { %v478_v35 = vadd.s32 1, %v691_v34  ;;  %v516_v8 = vshll.u32 %v476_v58, 8 }
  0xe3   :  { %vm479_vm3 = vcmp.gt.s32.totalorder %v478_v35, 0 }
  0xe4   :  { %v480_v37 = vsel %vm479_vm3, %v478_v35, 0 }
  0xe5   :  { %v482_v38 = vand.u32 31, %v480_v37  ;;  %v481_v41 = vshrl.u32 %v480_v37, 5 }
  0xe7   :  { %v483_v40 = vsub.s32 32, %v482_v38  ;;  %v485_v43 = vshll.u32 %v782_v42, %v482_v38  ;;  %v488_v45 = vshll.u32 %v783_v44, %v482_v38  ;;  %v491_v49 = vshll.u32 %v784_v47, %v482_v38 }
  0xe8   :  { %v494_v52 = vshll.u32 %v785_v50, %v482_v38  ;;  %v497_v55 = vshll.u32 %v786_v53, %v482_v38  ;;  %vm500_vm4 = vcmp.lt.s32.totalorder %v481_v41, 1  ;;  %vm503_vm5 = vcmp.lt.s32.totalorder %v481_v41, 4 }
  0xe9   :  { %v486_v46 = vshrl.u32 %v783_v44, %v483_v40  ;;  %v489_v48 = vshrl.u32 %v784_v47, %v483_v40  ;;  %v492_v51 = vshrl.u32 %v785_v50, %v483_v40  ;;  %v495_v54 = vshrl.u32 %v786_v53, %v483_v40 }
  0xea   :  { %v498_v57 = vshrl.u32 %v787_v56, %v483_v40  ;;  %v484_v3 = vshrl.u32 %v782_v42, %v483_v40  ;;  %vm502_vm6 = vcmp.lt.s32.totalorder %v481_v41, 3  ;;  %vm501_vm7 = vcmp.lt.s32.totalorder %v481_v41, 2 }
  0xeb   :  { %v487_v59 = vor.u32 %v486_v46, %v485_v43  ;;  %v490_v60 = vor.u32 %v489_v48, %v488_v45  ;;  %v493_v61 = vor.u32 %v492_v51, %v491_v49  ;;  %v496_v62 = vor.u32 %v495_v54, %v494_v52 }
  0xec   :  { %v499_v63 = vor.u32 %v498_v57, %v497_v55 }
  0xed   :  { %v505_v0 = vsel %vm503_vm5, %v493_v61, 2102212464  ;;  %v508_v1 = vsel %vm500_vm4, %v487_v59, %v490_v60  ;;  %v512_v2 = vsel %vm500_vm4, %v490_v60, %v493_v61  ;;  %v509_v4 = vsel %vm503_vm5, %v496_v62, 920167782 }
  0xee   :  { %v513_v5 = vsel %vm503_vm5, %v499_v63, 1326507024  ;;  %v510_v6 = vsel %vm502_vm6, %v493_v61, %v509_v4  ;;  %v504_v9 = vsel %vm500_vm4, %v484_v3, %v487_v59  ;;  %v506_v10 = vsel %vm502_vm6, %v490_v60, %v505_v0 }
  0xef   :  { %v514_v7 = vsel %vm502_vm6, %v496_v62, %v513_v5  ;;  %v511_v11 = vsel %vm501_vm7, %v508_v1, %v510_v6  ;;  %v507_v17 = vsel %vm501_vm7, %v504_v9, %v506_v10 }
  0xf0   :  { %v515_v12 = vsel %vm501_vm7, %v512_v2, %v514_v7  ;;  %v825_v15 = vmul.u32.u64.low %v516_v8, %v511_v11  ;;  %v826_v16 = vmul.u32.u64.high %v516_v8, %v511_v11, %v825_v15  ;;  %v523_v19 = vmul.u32 %v516_v8, %v507_v17 }
  0xf1   :  { %v822_v13 = vmul.u32.u64.low %v516_v8, %v515_v12  ;;  %v823_v14 = vmul.u32.u64.high %v516_v8, %v515_v12, %v822_v13 }
  0xf2   :  { %v526_v18 = vadd.s32 1, %v826_v16 }
  0xf3   :  { %vm525_vm8 = vc.u32 %v823_v14, %v825_v15  ;;  %v524_v32 = vadd.s32 %v825_v15, %v823_v14 }
  0xf4   :  { %v527_v20 = vsel %vm525_vm8, %v526_v18, %v826_v16 }
  0xf5   :  { %v528_v21 = vadd.s32 %v527_v20, %v523_v19 }
  0xf7   :  { %v529_v22 = vadd.s32 536870912, %v528_v21 }
  0xf9   :  { %v530_v23 = vshrl.u32 %v529_v22, 30 }
  0xfb   :  { %v531_v24 = vshll.u32 %v530_v23, 30  ;;  %v554_v46 = vsub.s32 4, %v530_v23 }
  0xfd   :  { %v532_v25 = vsub.s32 %v528_v21, %v531_v24  ;;  %v555_v49 = vsel %vm470_vm10, %v554_v46, %v530_v23 }
  0xfe   :  { %v557_v50 = vsel %vm469_vm11, 0, %v555_v49 }
  0xff   :  { %v534_v26 = vsub.s32 0, %v532_v25  ;;  %v561_v51 = vadd.s32 3, %v557_v50  ;;  %v666_v53 = vand.u32 3, %v557_v50 }
 0x101   :  { %v692_v27 = vmin.u32 %v534_v26, %v532_v25  ;;  %v562_v52 = vand.u32 3, %v561_v51  ;;  %vm671_vm13 = vcmp.eq.s32.totalorder %v666_v53, 2  ;;  %vm668_vm15 = vcmp.eq.s32.totalorder %v666_v53, 0 }
 0x102   :  { %vm667_vm1 = vcmp.lt.s32.totalorder %v666_v53, 2 }
 0x103   :  { %v536_v28 = vclz %v692_v27  ;;  %vm567_vm12 = vcmp.eq.s32.totalorder %v562_v52, 2  ;;  %vm564_vm14 = vcmp.eq.s32.totalorder %v562_v52, 0  ;;  %vm563_vm0 = vcmp.lt.s32.totalorder %v562_v52, 2 }
 0x105   :  { %v693_v29 = vadd.s32 4294967294, %v536_v28 }
 0x107   :  { %vm694_vm9 = vcmp.lt.s32.totalorder %v693_v29, 0 }
 0x108   :  { %v539_v30 = vsel %vm694_vm9, 0, %v693_v29 }
 0x109   :  { %v540_v33 = vsub.s32 32, %v539_v30  ;;  %v544_v34 = vsub.s32 4294967266, %v539_v30  ;;  %v541_v35 = vshll.u32 %v532_v25, %v539_v30 }
 0x10b   :  { %v542_v37 = vshrl.u32 %v524_v32, %v540_v33  ;;  %v545_v38 = vadd.s32 127, %v544_v34 }
 0x10d   :  { %v543_v39 = vor.u32 %v542_v37, %v541_v35  ;;  %v546_v40 = vshll.u32 %v545_v38, 23 }
 0x10f   :  { %v547_v41 = vor.u32 4788187, %v546_v40  ;;  %v550_v43 = vcvt.s32.f32 %v543_v39 }
 0x111   :  { %v548_v42 = vand.u32 2147483647, %v547_v41 }
 0x113   :  { %v551_v44 = vmul.f32 %v550_v43, %v548_v42 }
 0x115   :  { %v552_v45 = vxor.u32 2147483648, %v551_v44 }
 0x117   :  { %v553_v47 = vsel %vm470_vm10, %v552_v45, %v551_v44 }
 0x118   :  { %v556_v48 = vsel %vm469_vm11, %v816_v31, %v553_v47 }
 0x119   :  { %754 = vcosq.f32 %v556_v48 }
 0x11a   :  { %756 = vsinq.f32 %v556_v48 }
 0x126   :  { %v755_v54 = vpop.eup %754 }
 0x127   :  { %v757_v55 = vpop.eup %756  ;;  %v568_v56 = vxor.u32 2147483648, %v755_v54 }
 0x128   :  { %v565_v57 = vxor.u32 2147483648, %v757_v55 }
 0x129   :  { %v569_v36 = vsel %vm567_vm12, %v568_v56, %v757_v55  ;;  %v673_v58 = vsel %vm671_vm13, %v568_v56, %v757_v55 }
 0x12a   :  { %v566_v59 = vsel %vm564_vm14, %v755_v54, %v565_v57  ;;  %v670_v60 = vsel %vm668_vm15, %v755_v54, %v565_v57 }
 0x12b   :  { %v570_v61 = vsel %vm563_vm0, %v566_v59, %v569_v36  ;;  %v674_v62 = vsel %vm667_vm1, %v670_v60, %v673_v58 }
 0x12c   :  { %v571_v63 = vsel %vm560_vm2, nan, %v570_v61  ;;  %v675_v0 = vsel %vm560_vm2, nan, %v674_v62 }
 0x12d   :  { %572 = vst [vmem:[#allocation2] sm:$0xff] %v571_v63  ;;  %676 = vst [vmem:[#allocation2 + $0x8] sm:$0xff] %v675_v0 }
 0x12e   :  { %769 = shalt.err (!%p766_p4)
}
 0x12f   :  { %686 = dma.vmem_to_hbm [thread:$0]  %s684_s1, 256, %s842_s2, [#allocation3]  }
 0x130   :  { %778 = dma.done.wait [#allocation3], 256  }
 0x131   :  { %779 = vsyncadd [#allocation3], 4294967040 }
 0x132   :  { %690 = vsyncpa [#allocation3], 1 }

</bundles_post_ra>
